<compile_context>
chip_gen: v5e
topology: v5e:2x2
jax: 0.10.0
libtpu: 0.0.40
codegen_flags: <defaults>
</compile_context>

<pallas_src>
import functools

import jax
import jax.numpy as jnp
from jax.experimental import pallas as pl
from jax.experimental.pallas import tpu as pltpu


# ----------------------------------------------------------------------------
# Chamfer-distance kernel
#   grid = (batch, n_tiles): batch "parallel", N-tile "arbitrary" (last).
#   Per grid step (b, k):
#     s_ref : (1, S, 3)       structure / recon points (same block for all k)
#     g_ref : (1, 3, n_tile)  gt points, lane-dense tile k
#     out   : (1, 8, 128)     per-batch accumulator (value replicated on lanes)
#     min_sc: (S, 1)          running per-structure-point min across N tiles
# ----------------------------------------------------------------------------
def _chamfer_kernel(s_ref, g_ref, out_ref, min_sc, *, n_tile, n_valid,
                    need_mask):
    k = pl.program_id(1)
    nk = pl.num_programs(1)

    @pl.when(k == 0)
    def _():
        out_ref[...] = jnp.zeros_like(out_ref)
        min_sc[...] = jnp.full_like(min_sc, jnp.inf)

    # Exact squared distances built coordinate-wise on the VPU (no MXU K=3
    # matmul, no cancellation/clamp).  Each (S,1)/(1,n_tile) slice is used
    # exactly once per grid step, so there is no repeated broadcast to hoist.
    d = None
    for c in range(3):
        diff = s_ref[0, :, c:c + 1] - g_ref[0, c:c + 1, :]        # (S, n_tile)
        sq = diff * diff
        d = sq if d is None else d + sq

    if need_mask:
        # Only the zero-padded tail columns of the last tile are invalid;
        # they must neither win a min nor be counted in the gt->struct sum.
        col = k * n_tile + jax.lax.broadcasted_iota(jnp.int32, (1, n_tile), 1)
        valid = col < n_valid                                      # (1, n_tile)
        d_fwd = jnp.where(valid, d, jnp.inf)
    else:
        d_fwd = d

    # struct -> nearest gt: running min per structure point across N tiles.
    min_sc[...] = jnp.minimum(min_sc[...],
                              jnp.min(d_fwd, axis=1, keepdims=True))

    # gt -> nearest struct: each gt column's min over S is independent of the
    # N tiling, so it is summed per tile straight into the output accumulator.
    col_min = jnp.min(d, axis=0, keepdims=True)                    # (1, n_tile)
    if need_mask:
        col_min = jnp.where(valid, col_min, 0.0)
    out_ref[...] = out_ref[...] + jnp.sum(col_min)

    @pl.when(k == nk - 1)
    def _():
        out_ref[...] = out_ref[...] + jnp.sum(min_sc[...])


def chamfer_partials(recon_points, gt_points, *, n_tile_cap=512):
    """Per-batch un-normalised chamfer sums (fwd + bwd).

    recon_points: (B, S, 3) float32, gt_points: (B, N, 3) float32.
    Returns (B,) float32 with partial[b] = fwd_b + bwd_b.
    """
    B, S, D = recon_points.shape
    Bg, N, Dg = gt_points.shape
    assert D == 3 and Dg == 3 and Bg == B

    # Tile N so the (S, n_tile) temporaries stay small (VMEM / vreg friendly)
    # and the reduction axis supplies many pipelined grid steps.
    n_pad128 = -(-N // 128) * 128
    num_tiles = -(-n_pad128 // n_tile_cap)
    n_tile = -(-n_pad128 // (num_tiles * 128)) * 128
    n_pad = num_tiles * n_tile
    need_mask = n_pad != N

    s = recon_points.astype(jnp.float32)
    g = jnp.transpose(gt_points.astype(jnp.float32), (0, 2, 1))    # (B, 3, N)
    if need_mask:
        # Zero-pad ONLY the point axis; padded columns are masked in-kernel.
        g = jnp.pad(g, ((0, 0), (0, 0), (0, n_pad - N)))

    kernel = functools.partial(_chamfer_kernel, n_tile=n_tile, n_valid=N,
                               need_mask=need_mask)

    out = pl.pallas_call(
        kernel,
        out_shape=jax.ShapeDtypeStruct((B, 8, 128), jnp.float32),
        grid=(B, num_tiles),
        in_specs=[
            pl.BlockSpec((1, S, 3), lambda b, k: (b, 0, 0)),
            pl.BlockSpec((1, 3, n_tile), lambda b, k: (b, 0, k)),
        ],
        out_specs=pl.BlockSpec((1, 8, 128), lambda b, k: (b, 0, 0)),
        scratch_shapes=[pltpu.VMEM((S, 1), jnp.float32)],
        compiler_params=pltpu.CompilerParams(
            dimension_semantics=("parallel", "arbitrary"),
            vmem_limit_bytes=32 * 1024 * 1024),
    )(s, g)
    return out[:, 0, 0]


# ----------------------------------------------------------------------------
# SSE (sum of squared errors).  Covers all nn.MSELoss terms (shared
# normaliser, so the sum of SSEs is enough).
# ----------------------------------------------------------------------------
def _sse_kernel(a_ref, b_ref, out_ref):
    d = a_ref[...] - b_ref[...]            # (block_rows, 128)
    sq = d * d
    out_ref[0] = jnp.sum(sq.reshape(-1, 8, 128), axis=0)


def sse_total(a, b, *, force_pallas=False, block_rows_cap=512,
              min_pallas_elems=128 * 1024):
    """Sum of squared differences over all elements (any matching shapes)."""
    a_flat = a.reshape(-1).astype(jnp.float32)
    b_flat = b.reshape(-1).astype(jnp.float32)
    n = a_flat.shape[0]
    if (not force_pallas) and n < min_pallas_elems:
        # Typical consistent-loss tensors (T*B*S*3) are tiny: one fused XLA
        # reduction beats a pallas_call launch plus pad/reshape HBM passes.
        d = a_flat - b_flat
        return jnp.sum(d * d)

    lanes = 128
    rows = -(-n // lanes)
    rows = -(-rows // 8) * 8                    # multiple of 8 sublanes
    block_rows = min(rows, block_rows_cap)      # 512x128 f32 ~ 256 KiB / input
    n_blocks = -(-rows // block_rows)
    rows_p = n_blocks * block_rows
    pad = rows_p * lanes - n                    # zero pad contributes 0 to SSE
    a2 = jnp.pad(a_flat, (0, pad)).reshape(rows_p, lanes)
    b2 = jnp.pad(b_flat, (0, pad)).reshape(rows_p, lanes)

    out = pl.pallas_call(
        _sse_kernel,
        out_shape=jax.ShapeDtypeStruct((n_blocks, 8, 128), jnp.float32),
        grid=(n_blocks,),
        in_specs=[
            pl.BlockSpec((block_rows, 128), lambda i: (i, 0)),
            pl.BlockSpec((block_rows, 128), lambda i: (i, 0)),
        ],
        out_specs=pl.BlockSpec((1, 8, 128), lambda i: (i, 0, 0)),
        compiler_params=pltpu.CompilerParams(
            dimension_semantics=("parallel",)),
    )(a2, b2)
    return jnp.sum(out)


# ----------------------------------------------------------------------------
# ComputeLoss3d.forward equivalent.
# ----------------------------------------------------------------------------
def compute_loss3d(gt_points, structure_points,
                   transed_gt_points=None,
                   transed_structure_points=None,
                   trans_func_list=None):
    batch_size, pts_num, dim = gt_points.shape
    stpts_num = structure_points.shape[1]

    if transed_structure_points is not None:
        trans_num = transed_structure_points.shape[0]
        # Fuse plain + transformed chamfer into one kernel launch.
        s_all = jnp.concatenate(
            [structure_points,
             transed_structure_points.reshape(trans_num * batch_size,
                                              stpts_num, dim)], axis=0)
        g_all = jnp.concatenate(
            [gt_points,
             transed_gt_points.reshape(trans_num * batch_size,
                                       pts_num, dim)], axis=0)
        partials = chamfer_partials(s_all, g_all)                  # ((T+1)*B,)
        cd_plain = jnp.sum(partials[:batch_size]) / jnp.float32(batch_size)
        cd_trans = (jnp.sum(partials[batch_size:])
                    / jnp.float32(trans_num * batch_size))
        cd_loss = (cd_plain + cd_trans) / jnp.float32(trans_num + 1)

        # Consistent loss: all trans_num MSE terms share the same normaliser,
        # so one fused SSE suffices.
        tmp_stack = jnp.stack(
            [jax.lax.stop_gradient(trans_func_list[i](structure_points))
             for i in range(trans_num)], axis=0)                   # (T, B, S, 3)
        sse = sse_total(tmp_stack, transed_structure_points)
        consistent_loss = (sse / jnp.float32(batch_size * stpts_num * dim)
                           / jnp.float32(trans_num) * 1000.0)

        loss = cd_loss + consistent_loss
        return loss, cd_loss, consistent_loss

    # No-transform path.
    partials = chamfer_partials(structure_points, gt_points)
    cd_loss = jnp.sum(partials) / jnp.float32(batch_size)          # /(0+1)
    return cd_loss, cd_loss, None


# ----------------------------------------------------------------------------
# Pure-JAX reference (mirrors the PyTorch module) + demo
# ----------------------------------------------------------------------------
def _rot_z(theta):
    c, s = jnp.cos(theta), jnp.sin(theta)
    return jnp.array([[c, -s, 0.0],
                      [s, c, 0.0],
                      [0.0, 0.0, 1.0]], dtype=jnp.float32)


def _cd_ref(recon, gt):
    d = jnp.sum((recon[:, :, None, :] - gt[:, None, :, :]) ** 2, axis=-1)
    return (jnp.sum(jnp.min(d, axis=2)) + jnp.sum(jnp.min(d, axis=1))) \
        / recon.shape[0]


def _loss_ref(gt, sp, tgt, tsp, funcs):
    B, N, D = gt.shape
    T, _, S, _ = tsp.shape
    cd = _cd_ref(sp, gt) + _cd_ref(tsp.reshape(T * B, S, D),
                                   tgt.reshape(T * B, N, D))
    cd = cd / (T + 1)
    cons = 0.0
    for i in range(T):
        tmp = jax.lax.stop_gradient(funcs[i](sp))
        cons = cons + jnp.mean((tmp - tsp[i]) ** 2)
    cons = cons / T * 1000.0
    return cd + cons, cd, cons


if __name__ == "__main__":
    key = jax.random.PRNGKey(0)
    B, N, S, D = 2, 640, 16, 3        # batch, gt pts, structure pts, xyz
    trans_num = 2                     # N=640 -> 2 N-tiles + in-kernel mask

    k_gt, k_st, k_noise, k_sse = jax.random.split(key, 4)
    gt_points = jax.random.normal(k_gt, (B, N, D), dtype=jnp.float32)
    structure_points = jax.random.normal(k_st, (B, S, D), dtype=jnp.float32)

    thetas = [jnp.float32(0.3), jnp.float32(-0.7)]
    rots = [_rot_z(t) for t in thetas]
    trans_func_list = [functools.partial(lambda pts, R: pts @ R.T, R=R)
                       for R in rots]

    transed_gt_points = jnp.stack([f(gt_points) for f in trans_func_list])
    noise = 0.01 * jax.random.normal(k_noise, (trans_num, B, S, D),
                                     dtype=jnp.float32)
    transed_structure_points = jnp.stack(
        [f(structure_points) for f in trans_func_list]) + noise

    # jit the whole loss so the wrapper-side transpose / pad / concat fuse
    # with the pallas_call inputs (fewer HBM passes over the gt cloud).
    loss_fn = jax.jit(lambda gt, sp, tgt, tsp: compute_loss3d(
        gt, sp, transed_gt_points=tgt, transed_structure_points=tsp,
        trans_func_list=trans_func_list))
    loss, cd_loss, consistent_loss = loss_fn(
        gt_points, structure_points, transed_gt_points,
        transed_structure_points)
    jax.block_until_ready(loss)

    # Correctness vs. pure-JAX reference of the PyTorch module.
    ref_loss, ref_cd, ref_cons = _loss_ref(
        gt_points, structure_points, transed_gt_points,
        transed_structure_points, trans_func_list)
    assert jnp.allclose(loss, ref_loss, rtol=5e-4, atol=1e-3)
    assert jnp.allclose(cd_loss, ref_cd, rtol=5e-4, atol=1e-3)
    assert jnp.allclose(consistent_loss, ref_cons, rtol=5e-4, atol=1e-3)

    # No-transform path.
    loss_simple, cd_simple, _ = compute_loss3d(gt_points, structure_points)
    jax.block_until_ready(loss_simple)
    assert jnp.allclose(cd_simple, _cd_ref(structure_points, gt_points),
                        rtol=5e-4, atol=1e-3)

    # Exercise the Pallas SSE path (used automatically for large tensors).
    a = jax.random.normal(k_sse, (320, 513), dtype=jnp.float32)
    b = a + 0.1
    sse_pallas = sse_total(a, b, force_pallas=True)
    jax.block_until_ready(sse_pallas)
    assert jnp.allclose(sse_pallas, jnp.sum((a - b) ** 2), rtol=1e-3, atol=1e-2)

    print("KERNEL_OK")
</pallas_src>

<mosaic_0001>
module attributes {stable_mosaic.version = 11 : i64} {
  func.func @_chamfer_kernel(%arg0: i32, %arg1: i32, %arg2: memref<1x16x3xf32, #tpu.memory_space<vmem>>, %arg3: memref<1x3x384xf32, #tpu.memory_space<vmem>>, %arg4: memref<1x8x128xf32, #tpu.memory_space<vmem>>, %arg5: memref<16x1xf32, #tpu.memory_space<vmem>>) attributes {dimension_semantics = [#tpu.dimension_semantics<parallel>, #tpu.dimension_semantics<arbitrary>], iteration_bounds = array<i64: 6, 2>, scalar_prefetch = 0 : i64, scratch_operands = 1 : i64, tpu.core_type = #tpu.core_type<tc>, window_params = [{transform_indices = @transform_0, window_bounds = array<i64: 1, 16, 3>}, {transform_indices = @transform_1, window_bounds = array<i64: 1, 3, 384>}, {transform_indices = @transform_2, window_bounds = array<i64: 1, 8, 128>}]} {
    %c0_i32 = arith.constant 0 : i32
    %0 = arith.cmpi eq, %arg1, %c0_i32 : i32
    %1 = arith.extui %0 : i1 to i32
    %c0_i32_0 = arith.constant 0 : i32
    %2 = arith.cmpi ne, %1, %c0_i32_0 : i32
    scf.if %2 {
      %cst_31 = arith.constant 0.000000e+00 : f32
      %59 = vector.broadcast %cst_31 : f32 to vector<1x8x128xf32>
      %c0_32 = arith.constant 0 : index
      %c0_33 = arith.constant 0 : index
      %c0_34 = arith.constant 0 : index
      %60 = vector.load %arg4[%c0_32, %c0_33, %c0_34] : memref<1x8x128xf32, #tpu.memory_space<vmem>>, vector<1x8x128xf32>
      tpu.vector_store %arg4[%c0_32, %c0_33, %c0_34], %59 {strides = array<i32>} : memref<1x8x128xf32, #tpu.memory_space<vmem>>, vector<1x8x128xf32>,
      %cst_35 = arith.constant 0x7F800000 : f32
      %61 = vector.broadcast %cst_35 : f32 to vector<16x1xf32>
      %c0_36 = arith.constant 0 : index
      %c0_37 = arith.constant 0 : index
      %62 = vector.load %arg5[%c0_36, %c0_37] : memref<16x1xf32, #tpu.memory_space<vmem>>, vector<16x1xf32>
      tpu.vector_store %arg5[%c0_36, %c0_37], %61 {strides = array<i32>} : memref<16x1xf32, #tpu.memory_space<vmem>>, vector<16x1xf32>,
    } else {
    }
    %c0 = arith.constant 0 : index
    %c0_1 = arith.constant 0 : index
    %c0_2 = arith.constant 0 : index
    %3 = vector.load %arg2[%c0, %c0_1, %c0_2] : memref<1x16x3xf32, #tpu.memory_space<vmem>>, vector<1x16x1xf32>
    %4 = vector.shape_cast %3 : vector<1x16x1xf32> to vector<16x1xf32>
    %c0_3 = arith.constant 0 : index
    %c0_4 = arith.constant 0 : index
    %c0_5 = arith.constant 0 : index
    %5 = vector.load %arg3[%c0_3, %c0_4, %c0_5] : memref<1x3x384xf32, #tpu.memory_space<vmem>>, vector<1x1x384xf32>
    %6 = vector.shape_cast %5 : vector<1x1x384xf32> to vector<1x384xf32>
    %7 = vector.broadcast %4 : vector<16x1xf32> to vector<16x384xf32>
    %8 = vector.broadcast %6 : vector<1x384xf32> to vector<16x384xf32>
    %9 = arith.subf %7, %8 : vector<16x384xf32>
    %10 = arith.mulf %9, %9 : vector<16x384xf32>
    %c0_6 = arith.constant 0 : index
    %c0_7 = arith.constant 0 : index
    %c1 = arith.constant 1 : index
    %11 = vector.load %arg2[%c0_6, %c0_7, %c1] : memref<1x16x3xf32, #tpu.memory_space<vmem>>, vector<1x16x1xf32>
    %12 = vector.shape_cast %11 : vector<1x16x1xf32> to vector<16x1xf32>
    %c0_8 = arith.constant 0 : index
    %c1_9 = arith.constant 1 : index
    %c0_10 = arith.constant 0 : index
    %13 = vector.load %arg3[%c0_8, %c1_9, %c0_10] : memref<1x3x384xf32, #tpu.memory_space<vmem>>, vector<1x1x384xf32>
    %14 = vector.shape_cast %13 : vector<1x1x384xf32> to vector<1x384xf32>
    %15 = vector.broadcast %12 : vector<16x1xf32> to vector<16x384xf32>
    %16 = vector.broadcast %14 : vector<1x384xf32> to vector<16x384xf32>
    %17 = arith.subf %15, %16 : vector<16x384xf32>
    %18 = arith.mulf %17, %17 : vector<16x384xf32>
    %19 = arith.addf %10, %18 : vector<16x384xf32>
    %c0_11 = arith.constant 0 : index
    %c0_12 = arith.constant 0 : index
    %c2 = arith.constant 2 : index
    %20 = vector.load %arg2[%c0_11, %c0_12, %c2] : memref<1x16x3xf32, #tpu.memory_space<vmem>>, vector<1x16x1xf32>
    %21 = vector.shape_cast %20 : vector<1x16x1xf32> to vector<16x1xf32>
    %c0_13 = arith.constant 0 : index
    %c2_14 = arith.constant 2 : index
    %c0_15 = arith.constant 0 : index
    %22 = vector.load %arg3[%c0_13, %c2_14, %c0_15] : memref<1x3x384xf32, #tpu.memory_space<vmem>>, vector<1x1x384xf32>
    %23 = vector.shape_cast %22 : vector<1x1x384xf32> to vector<1x384xf32>
    %24 = vector.broadcast %21 : vector<16x1xf32> to vector<16x384xf32>
    %25 = vector.broadcast %23 : vector<1x384xf32> to vector<16x384xf32>
    %26 = arith.subf %24, %25 : vector<16x384xf32>
    %27 = arith.mulf %26, %26 : vector<16x384xf32>
    %28 = arith.addf %19, %27 : vector<16x384xf32>
    %c384_i32 = arith.constant 384 : i32
    %29 = arith.muli %arg1, %c384_i32 : i32
    %30 = tpu.iota {dimensions = array<i32: 1>} : vector<1x384xi32>
    %31 = vector.broadcast %29 : i32 to vector<1x384xi32>
    %32 = arith.addi %31, %30 : vector<1x384xi32>
    %c640_i32 = arith.constant 640 : i32
    %33 = vector.broadcast %c640_i32 : i32 to vector<1x384xi32>
    %34 = arith.cmpi slt, %32, %33 : vector<1x384xi32>
    %cst = arith.constant 0x7F800000 : f32
    %35 = vector.shape_cast %34 : vector<1x384xi1> to vector<1x384xi1>
    %36 = vector.broadcast %35 : vector<1x384xi1> to vector<16x384xi1>
    %37 = vector.broadcast %cst : f32 to vector<16x384xf32>
    %38 = arith.select %36, %28, %37 : vector<16x384xi1>, vector<16x384xf32>
    %c0_16 = arith.constant 0 : index
    %c0_17 = arith.constant 0 : index
    %39 = vector.load %arg5[%c0_16, %c0_17] : memref<16x1xf32, #tpu.memory_space<vmem>>, vector<16x1xf32>
    %cst_18 = arith.constant dense<0x7F800000> : vector<16xf32>
    %40 = vector.multi_reduction <minimumf>, %38, %cst_18 [1] : vector<16x384xf32> to vector<16xf32>
    %41 = vector.shape_cast %40 : vector<16xf32> to vector<16x1xf32>
    %42 = arith.minimumf %39, %41 : vector<16x1xf32>
    %c0_19 = arith.constant 0 : index
    %c0_20 = arith.constant 0 : index
    %43 = vector.load %arg5[%c0_19, %c0_20] : memref<16x1xf32, #tpu.memory_space<vmem>>, vector<16x1xf32>
    tpu.vector_store %arg5[%c0_19, %c0_20], %42 {strides = array<i32>} : memref<16x1xf32, #tpu.memory_space<vmem>>, vector<16x1xf32>,
    %cst_21 = arith.constant dense<0x7F800000> : vector<384xf32>
    %44 = vector.multi_reduction <minimumf>, %28, %cst_21 [0] : vector<16x384xf32> to vector<384xf32>
    %45 = vector.shape_cast %44 : vector<384xf32> to vector<1x384xf32>
    %cst_22 = arith.constant 0.000000e+00 : f32
    %46 = vector.broadcast %cst_22 : f32 to vector<1x384xf32>
    %47 = arith.select %34, %45, %46 : vector<1x384xi1>, vector<1x384xf32>
    %c0_23 = arith.constant 0 : index
    %c0_24 = arith.constant 0 : index
    %c0_25 = arith.constant 0 : index
    %48 = vector.load %arg4[%c0_23, %c0_24, %c0_25] : memref<1x8x128xf32, #tpu.memory_space<vmem>>, vector<1x8x128xf32>
    %49 = vector.shape_cast %47 : vector<1x384xf32> to vector<1x1x384xf32>
    %cst_26 = arith.constant dense<0.000000e+00> : vector<1xf32>
    %50 = vector.multi_reduction <add>, %49, %cst_26 [1, 2] : vector<1x1x384xf32> to vector<1xf32>
    %51 = vector.shape_cast %50 : vector<1xf32> to vector<1x1x1xf32>
    %52 = vector.extract %51[0, 0, 0] : f32 from vector<1x1x1xf32>
    %53 = vector.broadcast %52 : f32 to vector<1x8x128xf32>
    %54 = arith.addf %48, %53 : vector<1x8x128xf32>
    %c0_27 = arith.constant 0 : index
    %c0_28 = arith.constant 0 : index
    %c0_29 = arith.constant 0 : index
    %55 = vector.load %arg4[%c0_27, %c0_28, %c0_29] : memref<1x8x128xf32, #tpu.memory_space<vmem>>, vector<1x8x128xf32>
    tpu.vector_store %arg4[%c0_27, %c0_28, %c0_29], %54 {strides = array<i32>} : memref<1x8x128xf32, #tpu.memory_space<vmem>>, vector<1x8x128xf32>,
    %c1_i32 = arith.constant 1 : i32
    %56 = arith.cmpi eq, %arg1, %c1_i32 : i32
    %57 = arith.extui %56 : i1 to i32
    %c0_i32_30 = arith.constant 0 : i32
    %58 = arith.cmpi ne, %57, %c0_i32_30 : i32
    scf.if %58 {
      %c0_31 = arith.constant 0 : index
      %c0_32 = arith.constant 0 : index
      %c0_33 = arith.constant 0 : index
      %59 = vector.load %arg4[%c0_31, %c0_32, %c0_33] : memref<1x8x128xf32, #tpu.memory_space<vmem>>, vector<1x8x128xf32>
      %c0_34 = arith.constant 0 : index
      %c0_35 = arith.constant 0 : index
      %60 = vector.load %arg5[%c0_34, %c0_35] : memref<16x1xf32, #tpu.memory_space<vmem>>, vector<16x1xf32>
      %61 = vector.shape_cast %60 : vector<16x1xf32> to vector<1x16x1xf32>
      %cst_36 = arith.constant dense<0.000000e+00> : vector<1xf32>
      %62 = vector.multi_reduction <add>, %61, %cst_36 [1, 2] : vector<1x16x1xf32> to vector<1xf32>
      %63 = vector.shape_cast %62 : vector<1xf32> to vector<1x1x1xf32>
      %64 = vector.extract %63[0, 0, 0] : f32 from vector<1x1x1xf32>
      %65 = vector.broadcast %64 : f32 to vector<1x8x128xf32>
      %66 = arith.addf %59, %65 : vector<1x8x128xf32>
      %c0_37 = arith.constant 0 : index
      %c0_38 = arith.constant 0 : index
      %c0_39 = arith.constant 0 : index
      %67 = vector.load %arg4[%c0_37, %c0_38, %c0_39] : memref<1x8x128xf32, #tpu.memory_space<vmem>>, vector<1x8x128xf32>
      tpu.vector_store %arg4[%c0_37, %c0_38, %c0_39], %66 {strides = array<i32>} : memref<1x8x128xf32, #tpu.memory_space<vmem>>, vector<1x8x128xf32>,
    } else {
    }
    return
  }
  func.func @transform_0(%arg0: i32, %arg1: i32) -> (i32, i32, i32) {
    %c0_i32 = arith.constant 0 : i32
    %c0_i32_0 = arith.constant 0 : i32
    %c0_i32_1 = arith.constant 0 : i32
    return %arg0, %c0_i32, %c0_i32_0 : i32, i32, i32
  }
  func.func @transform_1(%arg0: i32, %arg1: i32) -> (i32, i32, i32) {
    %c0_i32 = arith.constant 0 : i32
    %c0_i32_0 = arith.constant 0 : i32
    return %arg0, %c0_i32, %arg1 : i32, i32, i32
  }
  func.func @transform_2(%arg0: i32, %arg1: i32) -> (i32, i32, i32) {
    %c0_i32 = arith.constant 0 : i32
    %c0_i32_0 = arith.constant 0 : i32
    %c0_i32_1 = arith.constant 0 : i32
    return %arg0, %c0_i32, %c0_i32_0 : i32, i32, i32
  }
}

</mosaic_0001>

<bundles_post_ra>
// kernel: _lambda_.1
= control target key start
LH: loop header
LB: loop body
LE: loop exit
PB: predicated region body
PF: predicated region fallthrough
CT: control target
= control target key end

     0   :  { %s616_s9 = smov 0   ;;  %s618_s10 = smov 0   ;;  %s719_s0 = inlined_call_operand.vmem [shape: f32[6,16,3], index: 0, kind: input, shape index: {}]   ;;  %s720_s1 = inlined_call_operand.vmem [shape: f32[6,3,768], index: 1, kind: input, shape index: {}]   ;;  %s721_s2 = inlined_call_operand.vmem [shape: f32[6,8,128], index: 2, kind: output, shape index: {}]  }
   0x1   :  { %s620_s11 = smov 0   ;;  %s622_s12 = smov 0  }
   0x2   :  { %s624_s13 = smov 0  }
   0x3 LB: > { %s21_s14 = sadd.s32 1, %s586_s11  ;;  %s24_s15 = sadd.s32 1, %s590_s12  ;;  %s594_s13 = sphi %s624_s13, %s12_s13   ;;  %s590_s12 = sphi %s622_s12, %s725_s12   ;;  %s586_s11 = sphi %s620_s11, %s724_s11   ;;  %s582_s10 = sphi %s618_s10, %s723_s10   ;;  %s578_s9 = sphi %s616_s9, %s722_s9  }
   0x4   : > { %p22_p0 = scmp.ge.s32.totalorder %s21_s14, 2  ;;  %p490_p1 = scmp.ge.s32.totalorder %s594_s13, 1 }
   0x5   : > { %p141_p2 = scmp.lt.s32.totalorder %s594_s13, 13 }
   0x6   : > { %s727_s14 = smov (%p22_p0, %s21_s14), 0  ;;  %s729_s15 = smov (!%p22_p0, %s24_s15), %s590_s12 }
   0x7   : > { %p142_p3 = pnand %p490_p1, %p141_p2  ;;  %p26_p4 = scmp.ge.s32.totalorder %s729_s15, 6 }
   0x8   : > { %p171_p5 = scmp.lt.s32.totalorder (!%p142_p3), %s582_s10, 5  ;;  %s176_s16 = smul.u32 (!%p142_p3), 3, %s578_s9 }
   0x9   : > { %s731_s15 = smov (%p26_p4, %s729_s15), 0  ;;  %145 = sbr.rel (%p142_p3) target bundleno = 549 (0x225), region = 28 }
   0xa   : > { %p179_p6 = scmp.lt.s32.totalorder (!%p142_p3), %s176_s16, 5  ;;  %p495_p7 = scmp.ne.s32.totalorder (!%p142_p3), %s578_s9, 0 }
   0xe   : > { %s733_s10 = smov (!%p171_p5, %s582_s10), 5  ;;  %s735_s16 = smov (!%p179_p6, %s176_s16), 5 }
   0xf   : > { %s501_s17 = sshll.u32 %s733_s10, 4  ;;  %s502_s18 = smul.u32 6, %s733_s10 }
  0x10   : > { %s175_s21 = scalar_lea.vmem %s719_s0, %s501_s17  ;;  %s494_s22 = sshll.u32 %s733_s10, 3 }
  0x11   : > { %s655_s25 = scalar_lea.vmem %s721_s2, %s494_s22  ;;  %s182_s26 = sadd.s32 %s502_s18, %s735_s16 }
  0x12   : > { %s493_s27 = sshll.u32 %s182_s26, 2  ;;  %193 = sbr.rel (%p495_p7) target bundleno = 27 (0x1b), region = 32 }
  0x13   : > { %s660_s30 = scalar_lea.vmem %s720_s1, %s493_s27 }
  0x17   : > { %vm195_vm0 = vcmask 7168   ;;  %v596_v0 = vmov 0.0   ;;  %v597_v1 = vmov inf  }
  0x18   : > { %194 = vst [vmem:[%s655_s25] sm:$0xff] %v596_v0 }
  0x19   : > { %196 = vst.msk [vmem:[#allocation2] sm:$0xff] %vm195_vm0, %v597_v1 }
  0x1a   : > { %197 = vst.msk [vmem:[#allocation2 + $0x8] sm:$0xff] %vm195_vm0, %v597_v1 }
  0x1b PF: > { %v198_v2 = vld [vmem:[%s175_s21] sm:$0xff]  ;;  %v598_v3 = vmov 1   ;;  %v599_v4 = vmov 0   ;;  %v600_v5 = vmov 2   ;;  %v199_v6 = vld [vmem:[%s175_s21 + $0x8] sm:$0xff]  ;;  %v301_v7 = vlaneseq  ;;  %s300_s3 = smul.u32 384, %s578_s9 }
  0x1c   : > { %553 = vset.pattern.permute.xlu1 %v598_v3  ;;  %552 = vset.pattern.permute.xlu0 %v599_v4  ;;  %v497_v8 = vld [vmem:[%s660_s30 + $0x2] ss:$4 sm:$0x7]  ;;  %v496_v10 = vld [vmem:[%s660_s30 + $0x1] ss:$4 sm:$0x7] }
  0x1d   : > { %233 = vperm.xlu1 %553, %v198_v2   ;;  %203 = vperm.xlu0 %552, %v198_v2   ;;  %v302_v9 = vand.u32 127, %v301_v7  ;;  %v276_v11 = vperm.slane %v497_v8, 0  ;;  %v200_v12 = vld [vmem:[%s660_s30] ss:$4 sm:$0x7]  ;;  %v278_v14 = vperm.slane %v497_v8, 2  ;;  %v305_v21 = vstv %s300_s3 }
  0x1e   : > { %554 = vset.pattern.permute.xlu2 %v600_v5  ;;  %v241_v15 = vperm.slane %v496_v10, 0  ;;  %v242_v18 = vperm.slane %v496_v10, 1  ;;  %v243_v19 = vperm.slane %v496_v10, 2  ;;  %v212_v20 = vperm.slane %v200_v12, 0  ;;  %p498_p8 = scmp.ne.s32.totalorder %s578_s9, 1 }
  0x1f   : > { %268 = vperm.xlu2 %554, %v198_v2   ;;  %v303_v16 = vadd.s32 128, %v302_v9  ;;  %v304_v17 = vadd.s32 256, %v302_v9  ;;  %v277_v22 = vperm.slane %v497_v8, 1  ;;  %v213_v24 = vperm.slane %v200_v12, 1 }
  0x20   : > { %v214_v25 = vperm.slane %v200_v12, 2  ;;  %v668_v29 = vadd.s32 %v305_v21, %v302_v9  ;;  %vm364_vm4 = vcmask 1040384   ;;  %vm336_vm5 = vcmask 7168  }
  0x21   : > { %v670_v30 = vadd.s32 %v305_v21, %v303_v16  ;;  %v672_v31 = vadd.s32 %v305_v21, %v304_v17 }
  0x22   : > { %vm309_vm1 = vcmp.lt.s32.totalorder %v668_v29, 640  ;;  %v325_v29 = vld [vmem:[#allocation2 + $0x8] sm:$0xff] }
  0x23   : > { %vm310_vm2 = vcmp.lt.s32.totalorder %v670_v30, 640  ;;  %vm311_vm3 = vcmp.lt.s32.totalorder %v672_v31, 640 }
  0x25   : > { %237 = vperm.xlu1 %553, %v199_v6   ;;  %208 = vperm.xlu0 %552, %v199_v6  }
  0x27   : > { %272 = vperm.xlu2 %554, %v199_v6  }
  0x2d   : > { %555 = vset.pattern.permute.xlu0 %v600_v5 }
  0x79   : > { %v269_v13 = vpop.permute.xlu2 %268 }
  0x7a   : > { %v282_v23 = vsub.f32 %v269_v13, %v276_v11  ;;  %v284_v26 = vsub.f32 %v269_v13, %v278_v14  ;;  %v283_v36 = vsub.f32 %v269_v13, %v277_v22 }
  0x7c   : > { %v288_v37 = vmul.f32 %v282_v23, %v282_v23  ;;  %v290_v44 = vmul.f32 %v284_v26, %v284_v26  ;;  %v289_v49 = vmul.f32 %v283_v36, %v283_v36 }
  0x81   : > { %v273_v48 = vpop.permute.xlu2 %272 }
  0x82   : > { %v285_v53 = vsub.f32 %v273_v48, %v276_v11  ;;  %v286_v54 = vsub.f32 %v273_v48, %v277_v22  ;;  %v287_v55 = vsub.f32 %v273_v48, %v278_v14 }
  0x84   : > { %v291_v10 = vmul.f32 %v285_v53, %v285_v53  ;;  %v292_v11 = vmul.f32 %v286_v54, %v286_v54  ;;  %v293_v14 = vmul.f32 %v287_v55, %v287_v55 }
  0x8f   : > { %v234_v27 = vpop.permute.xlu1 %233  ;;  %v204_v28 = vpop.permute.xlu0 %203 }
  0x90   : > { %v247_v32 = vsub.f32 %v234_v27, %v241_v15  ;;  %v248_v33 = vsub.f32 %v234_v27, %v242_v18  ;;  %v249_v34 = vsub.f32 %v234_v27, %v243_v19  ;;  %v218_v35 = vsub.f32 %v204_v28, %v212_v20 }
  0x91   : > { %v219_v38 = vsub.f32 %v204_v28, %v213_v24  ;;  %v220_v39 = vsub.f32 %v204_v28, %v214_v25 }
  0x92   : > { %v253_v40 = vmul.f32 %v247_v32, %v247_v32  ;;  %v254_v41 = vmul.f32 %v248_v33, %v248_v33  ;;  %v255_v42 = vmul.f32 %v249_v34, %v249_v34  ;;  %v224_v43 = vmul.f32 %v218_v35, %v218_v35 }
  0x93   : > { %v225_v45 = vmul.f32 %v219_v38, %v219_v38  ;;  %v226_v46 = vmul.f32 %v220_v39, %v220_v39 }
  0x94   : > { %v259_v47 = vadd.f32 %v253_v40, %v224_v43 }
  0x95   : > { %v260_v50 = vadd.f32 %v254_v41, %v225_v45  ;;  %v261_v51 = vadd.f32 %v255_v42, %v226_v46 }
  0x96   : > { %v294_v52 = vadd.f32 %v288_v37, %v259_v47 }
  0x97   : > { %v238_v56 = vpop.permute.xlu1 %237  ;;  %v209_v57 = vpop.permute.xlu0 %208  ;;  %v296_v58 = vadd.f32 %v290_v44, %v261_v51  ;;  %v295_v1 = vadd.f32 %v289_v49, %v260_v50 }
  0x98   : > { %v250_v59 = vsub.f32 %v238_v56, %v241_v15  ;;  %v251_v60 = vsub.f32 %v238_v56, %v242_v18  ;;  %v252_v61 = vsub.f32 %v238_v56, %v243_v19  ;;  %v221_v62 = vsub.f32 %v209_v57, %v212_v20 }
  0x99   : > { %v222_v63 = vsub.f32 %v209_v57, %v213_v24  ;;  %v223_v0 = vsub.f32 %v209_v57, %v214_v25  ;;  %v318_v2 = vsel %vm309_vm1, %v294_v52, inf  ;;  %v320_v9 = vsel %vm311_vm3, %v296_v58, inf }
  0x9a   : > { %v256_v3 = vmul.f32 %v250_v59, %v250_v59  ;;  %v257_v4 = vmul.f32 %v251_v60, %v251_v60  ;;  %v258_v5 = vmul.f32 %v252_v61, %v252_v61  ;;  %v227_v6 = vmul.f32 %v221_v62, %v221_v62  ;;  %v324_v59 = vld [vmem:[#allocation2] sm:$0xff] }
  0x9b   : > { %v228_v7 = vmul.f32 %v222_v63, %v222_v63  ;;  %v229_v8 = vmul.f32 %v223_v0, %v223_v0  ;;  %v326_v13 = vmin.f32 %v318_v2, %v320_v9  ;;  %v319_v17 = vsel %vm310_vm2, %v295_v1, inf }
  0x9c   : > { %v262_v12 = vadd.f32 %v256_v3, %v227_v6 }
  0x9d   : > { %v263_v15 = vadd.f32 %v257_v4, %v228_v7  ;;  %v264_v16 = vadd.f32 %v258_v5, %v229_v8  ;;  %v327_v18 = vmin.f32 %v326_v13, %v319_v17  ;;  %v363_v5 = vld [vmem:[%s655_s25] sm:$0xff] }
  0x9e   : > { %v297_v19 = vadd.f32 %v291_v10, %v262_v12 }
  0x9f   : > { %v298_v20 = vadd.f32 %v292_v11, %v263_v15  ;;  %v299_v21 = vadd.f32 %v293_v14, %v264_v16  ;;  %328 = vmin.xlane.f32.xlu1 %v327_v18 }
  0xa0   : > { %v321_v22 = vsel %vm309_vm1, %v297_v19, inf  ;;  %v339_v23 = vmin.f32 %v294_v52, %v297_v19 }
  0xa1   : > { %v323_v24 = vsel %vm311_vm3, %v299_v21, inf  ;;  %v346_v25 = vmin.f32 %v295_v1, %v298_v20  ;;  %v353_v26 = vmin.f32 %v296_v58, %v299_v21  ;;  %v322_v32 = vsel %vm310_vm2, %v298_v20, inf }
  0xa2   : > { %v330_v27 = vmin.f32 %v321_v22, %v323_v24  ;;  %v340_v28 = vrot.slane %v339_v23, 4 }
  0xa3   : > { %v347_v33 = vrot.slane %v346_v25, 4  ;;  %v354_v34 = vrot.slane %v353_v26, 4 }
  0xa4   : > { %v331_v35 = vmin.f32 %v330_v27, %v322_v32  ;;  %v341_v36 = vmin.f32 %v339_v23, %v340_v28 }
  0xa5   : > { %v348_v37 = vmin.f32 %v346_v25, %v347_v33  ;;  %v355_v38 = vmin.f32 %v353_v26, %v354_v34 }
  0xa6   : > { %332 = vmin.xlane.f32.xlu2 %v331_v35  ;;  %v342_v39 = vrot.slane %v341_v36, 2 }
  0xa7   : > { %v349_v40 = vrot.slane %v348_v37, 2  ;;  %v356_v41 = vrot.slane %v355_v38, 2 }
  0xa8   : > { %v343_v42 = vmin.f32 %v341_v36, %v342_v39 }
  0xa9   : > { %v350_v43 = vmin.f32 %v348_v37, %v349_v40  ;;  %v357_v44 = vmin.f32 %v355_v38, %v356_v41 }
  0xaa   : > { %v344_v45 = vrot.slane %v343_v42, 1 }
  0xab   : > { %v351_v46 = vrot.slane %v350_v43, 1  ;;  %v358_v47 = vrot.slane %v357_v44, 1 }
  0xac   : > { %v345_v48 = vmin.f32 %v343_v42, %v344_v45 }
  0xad   : > { %v352_v49 = vmin.f32 %v350_v43, %v351_v46  ;;  %v359_v50 = vmin.f32 %v357_v44, %v358_v47 }
  0xae   : > { %v360_v51 = vsel %vm309_vm1, %v345_v48, 0.0 }
  0xaf   : > { %v361_v52 = vsel %vm310_vm2, %v352_v49, 0.0  ;;  %v362_v53 = vsel %vm311_vm3, %v359_v50, 0.0  ;;  %v365_v54 = vsel %vm364_vm4, %v360_v51, 0.0 }
  0xb0   : > { %v366_v55 = vsel %vm364_vm4, %v361_v52, 0.0  ;;  %v368_v57 = vsel %vm364_vm4, %v362_v53, 0.0 }
  0xb1   : > { %v367_v56 = vadd.f32 %v366_v55, %v365_v54 }
  0xb3   : > { %v369_v58 = vadd.f32 %v368_v57, %v367_v56 }
  0xb5   : > { %370 = vadd.xlane.f32.xlu0 %v369_v58 }
 0x112   : > { %v329_v60 = vpop.xlane.xlu1 %328 }
 0x113   : > { %v334_v61 = vmin.f32 %v324_v59, %v329_v60 }
 0x115   : > { %337 = vst.msk [vmem:[#allocation2] sm:$0xff] %vm336_vm5, %v334_v61 }
 0x119   : > { %v333_v30 = vpop.xlane.xlu2 %332 }
 0x11a   : > { %v335_v62 = vmin.f32 %v325_v29, %v333_v30 }
 0x11c   : > { %338 = vst.msk [vmem:[#allocation2 + $0x8] sm:$0xff] %vm336_vm5, %v335_v62 }
 0x128   : > { %v371_v31 = vpop.xlane.xlu0 %370 }
 0x129   : > { %v372_v63 = vrot.slane %v371_v31, 4 }
 0x12b   : > { %v373_v0 = vadd.f32 %v372_v63, %v371_v31 }
 0x12d   : > { %v374_v1 = vrot.slane %v373_v0, 2 }
 0x12f   : > { %v375_v2 = vadd.f32 %v374_v1, %v373_v0 }
 0x131   : > { %v376_v3 = vrot.slane %v375_v2, 1 }
 0x133   : > { %v377_v4 = vadd.f32 %v376_v3, %v375_v2 }
 0x135   : > { %503 = vpush %v377_v4 }
 0x166   : > { %s504_s4 = spop %503  ;;  %385 = sbr.rel (%p498_p8) target bundleno = 549 (0x225), region = 36 }
 0x167   : > { %v379_v6 = vstv %s504_s4 }
 0x168   : > { %v380_v7 = vadd.f32 %v379_v6, %v363_v5 }
 0x16a   : > { %381 = vst [vmem:[%s655_s25] sm:$0xff] %v380_v7 }
 0x16b   : > { %v387_v8 = vld [vmem:[#allocation2] sm:$0xff]  ;;  %v388_v9 = vld [vmem:[#allocation2 + $0x8] sm:$0xff] }
 0x16c   : > { %v389_v10 = vsel %vm336_vm5, %v387_v8, 0.0  ;;  %v390_v11 = vsel %vm336_vm5, %v388_v9, 0.0 }
 0x16d   : > { %v391_v12 = vadd.f32 %v390_v11, %v389_v10 }
 0x16f   : > { %392 = vadd.xlane.f32.xlu0 %v391_v12 }
 0x171   : > { %v386_v20 = vld [vmem:[%s655_s25] sm:$0xff] }
 0x1e2   : > { %v393_v13 = vpop.xlane.xlu0 %392 }
 0x1e3   : > { %v394_v14 = vrot.slane %v393_v13, 4 }
 0x1e5   : > { %v395_v15 = vadd.f32 %v394_v14, %v393_v13 }
 0x1e7   : > { %v396_v16 = vrot.slane %v395_v15, 2 }
 0x1e9   : > { %v397_v17 = vadd.f32 %v396_v16, %v395_v15 }
 0x1eb   : > { %v398_v18 = vrot.slane %v397_v17, 1 }
 0x1ed   : > { %v399_v19 = vadd.f32 %v398_v18, %v397_v17 }
 0x1ef   : > { %505 = vpush %v399_v19 }
 0x220   : > { %s506_s5 = spop %505 }
 0x221   : > { %v401_v21 = vstv %s506_s5 }
 0x222   : > { %v402_v22 = vadd.f32 %v401_v21, %v386_v20 }
 0x224   : > { %403 = vst [vmem:[%s655_s25] sm:$0xff] %v402_v22 }
 0x225 PF: > { %s12_s13 = sadd.s32 1, %s594_s13   ;;  %s722_s9 = smov %s586_s11 }
 0x226   : > { %p9_p9 = scmp.ge.s32.totalorder %s12_s13, 14   ;;  %s723_s10 = smov %s590_s12 }
 0x227   : > { %s724_s11 = smov %s727_s14  ;;  %s725_s12 = smov %s731_s15 }
 0x228   :  { %11 = sbr.rel (!%p9_p9) target bundleno = 3 (0x3), region = 71 }

</bundles_post_ra>
